<compile_context>
chip_gen: v6e
topology: v6e:2x2x1
jax: 0.10.0
libtpu: 0.0.40
codegen_flags: <defaults>
</compile_context>

<pallas_src>
import functools
import math

import jax
import jax.numpy as jnp
from jax.experimental import pallas as pl
from jax.experimental.pallas import tpu as pltpu


def saa_kernel(*refs, num_heads, d_k, seq_len, has_mask, has_rw):
    x_ref, wqkv_ref, bqkv_ref, wo_ref, bo_ref = refs[:5]
    idx = 5
    mask_ref = rw_ref = None
    if has_mask:
        mask_ref = refs[idx]; idx += 1
    if has_rw:
        rw_ref = refs[idx]; idx += 1
    o_ref = refs[idx]

    H = num_heads
    d_model = H * d_k
    bt = x_ref.shape[0]
    n_rows = bt * seq_len

    # ---- fused QKV projection: one [n_rows, D] @ [D, 3D] MXU matmul (bf16 in, f32 acc)
    x2 = x_ref[...].reshape(n_rows, d_model)                               # bf16
    qkv = jnp.dot(x2, wqkv_ref[...],
                  preferred_element_type=jnp.float32) + bqkv_ref[...]      # [n, 3D] f32
    q = qkv[:, :d_model].reshape(bt, seq_len, d_model).astype(jnp.bfloat16)
    k = qkv[:, d_model:2 * d_model].reshape(bt, seq_len, d_model).astype(jnp.bfloat16)
    v = qkv[:, 2 * d_model:].reshape(bt, seq_len, d_model).astype(jnp.bfloat16)

    # ---- head-batched layout [H*bt, S, dk]  (n = h*bt + b), built ONCE
    def to_heads(t):
        return jnp.concatenate(
            [t[:, :, h * d_k:(h + 1) * d_k] for h in range(H)], axis=0)
    qh, kh, vh = to_heads(q), to_heads(k), to_heads(v)

    # ---- attention scores, batched over all (head, batch) pairs
    scores = jnp.einsum("nqd,nkd->nqk", qh, kh,
                        preferred_element_type=jnp.float32)                # [H*bt, S, S] f32

    inv_sqrt_dk = 1.0 / math.sqrt(d_k)
    if has_rw:
        rw = rw_ref[...].astype(jnp.float32)                               # [bt, 1, S]
        scale = jnp.tile(rw, (H, 1, 1)) * inv_sqrt_dk                      # [H*bt, 1, S]
        if has_mask:
            # torch ordering: additive -1e9 mask BEFORE the (reweight/sqrt(dk)) scale
            scores = (scores - mask_ref[...]) * scale
        else:
            scores = scores * scale
    elif has_mask:
        # mask_ref is pre-scaled by 1/sqrt(dk) in the wrapper -> single fused pass
        scores = scores * inv_sqrt_dk - mask_ref[...]
    else:
        scores = scores * inv_sqrt_dk

    # ---- softmax in f32; reciprocal goes to the otherwise-idle EUP slot
    m = jnp.max(scores, axis=-1, keepdims=True)
    e = jnp.exp(scores - m)
    denom = jnp.sum(e, axis=-1, keepdims=True)
    attn = e * pl.reciprocal(denom, approx=True)

    # ---- attention @ V, batched over heads; regroup heads back on the lane dim
    ctx = jnp.einsum("nqk,nkd->nqd", attn.astype(jnp.bfloat16), vh,
                     preferred_element_type=jnp.float32)                   # [H*bt, S, dk] f32
    ctx = jnp.concatenate([ctx[h * bt:(h + 1) * bt] for h in range(H)],
                          axis=-1)                                         # [bt, S, D]
    ctx = ctx.reshape(n_rows, d_model).astype(jnp.bfloat16)

    # ---- output projection; store in whatever (lane-dense) layout o_ref uses
    out = jnp.dot(ctx, wo_ref[...],
                  preferred_element_type=jnp.float32) + bo_ref[...]
    o_ref[...] = out.reshape(o_ref.shape).astype(o_ref.dtype)


def _physical_vmem_bytes():
    """Per-core physical VMEM: 64 MiB on v7x, 128 MiB on v5e/v6e."""
    try:
        info = pltpu.get_tpu_info()
        cap = getattr(info, "vmem_capacity_bytes", None)
        if cap:
            return int(cap)
    except Exception:
        pass
    return 64 * 1024 * 1024  # conservative default (assume v7x)


def _pick_batch_tile(B, S, D, H, vmem_budget, has_mask, has_rw, out_bytes):
    """Largest divisor of B whose per-step working set fits the VMEM budget,
    capped so the grid has >= 2 steps (both v7x TensorCores get work)."""
    # Grid-invariant blocks (fused Wqkv, Wo, biases, mask); assume double-buffered.
    fixed = (D * 3 * D * 2 + D * D * 2 + 3 * D * 4 + D * 4) * 2
    if has_mask:
        fixed += S * S * 4 * 2
    budget = vmem_budget - fixed

    def step_bytes(bt):
        rows = bt * S
        io = (rows * D * 2 + rows * D * out_bytes) * 2      # x + out blocks, double-buffered
        if has_rw:
            io += bt * S * 4 * 2
        act = (rows * 3 * D * 4                              # qkv f32
               + 2 * 3 * rows * D * 2                        # q/k/v bf16 + head-split copies
               + rows * D * 4 + rows * D * 2)                # ctx f32 + bf16
        attn_ws = H * bt * S * S * (4 + 4 + 2)               # scores f32 + exp f32 + attn bf16
        return io + act + attn_ws

    best = 1
    for bt in range(1, B + 1):
        if B % bt == 0 and step_bytes(bt) <= budget:
            best = bt
    if B >= 2:                          # >= 2 grid steps -> megacore sharding on v7x
        best = min(best, B // 2)
        while B % best:
            best -= 1
    return max(best, 1)


def saa_forward(x, params, mask=False, attention_reweight=None,
                batch_tile=None, out_dtype=None):
    B, S, D = x.shape
    H = params["num_heads"]
    d_k = D // H
    out_dtype = x.dtype if out_dtype is None else out_dtype
    use_rw = attention_reweight is not None
    use_mask = bool(mask)
    inv_sqrt_dk = 1.0 / math.sqrt(d_k)

    phys_vmem = _physical_vmem_bytes()
    vmem_limit = int(phys_vmem * 0.75)        # ~48 MiB on v7x, ~96 MiB on v5e/v6e

    bt = batch_tile if batch_tile is not None else _pick_batch_tile(
        B, S, D, H, int(vmem_limit * 0.75), use_mask, use_rw,
        jnp.dtype(out_dtype).itemsize)
    assert B % bt == 0

    # Fused QKV weight [D, 3D] / bias [1, 3D]; bf16 matmul operands, f32 biases.
    w_qkv = jnp.concatenate(
        [params["wq"].T, params["wk"].T, params["wv"].T], axis=1).astype(jnp.bfloat16)
    b_qkv = jnp.concatenate(
        [params["bq"], params["bk"], params["bv"]]).reshape(1, 3 * D).astype(jnp.float32)
    w_o = params["wo"].T.astype(jnp.bfloat16)
    b_o = params["bo"].reshape(1, D).astype(jnp.float32)

    # Lane-dense HBM layout for x / out when D is not already a multiple of 128.
    # Only worthwhile once the tile has >= 8 batch rows; below that the flat block is
    # sublane-padded and no denser than the proven [bt, S, D] block.
    use_flat = (D % 128 != 0) and (bt >= 8)
    if use_flat:
        x_in = x.astype(jnp.bfloat16).reshape(B, 1, S * D)
        x_spec = pl.BlockSpec((bt, 1, S * D), lambda b: (b, 0, 0))
        out_struct = jax.ShapeDtypeStruct((B, 1, S * D), out_dtype)
        out_spec = pl.BlockSpec((bt, 1, S * D), lambda b: (b, 0, 0))
    else:
        x_in = x.astype(jnp.bfloat16)
        x_spec = pl.BlockSpec((bt, S, D), lambda b: (b, 0, 0))
        out_struct = jax.ShapeDtypeStruct((B, S, D), out_dtype)
        out_spec = pl.BlockSpec((bt, S, D), lambda b: (b, 0, 0))

    const2 = lambda b: (0, 0)
    inputs = [x_in, w_qkv, b_qkv, w_o, b_o]
    in_specs = [
        x_spec,
        pl.BlockSpec((D, 3 * D), const2),          # fused W_qkv (grid-invariant)
        pl.BlockSpec((1, 3 * D), const2),          # fused b_qkv
        pl.BlockSpec((D, D), const2),              # W_o
        pl.BlockSpec((1, D), const2),              # b_o
    ]
    if use_mask:
        tri = jnp.triu(jnp.ones((S, S), jnp.float32), k=1) * 1e9
        mask_bias = tri if use_rw else tri * inv_sqrt_dk   # pre-scale when no reweight
        inputs.append(mask_bias)
        in_specs.append(pl.BlockSpec((S, S), const2))
    if use_rw:
        rw = attention_reweight.astype(jnp.float32).reshape(B, 1, S)
        inputs.append(rw)
        in_specs.append(pl.BlockSpec((bt, 1, S), lambda b: (b, 0, 0)))

    kern = functools.partial(saa_kernel, num_heads=H, d_k=d_k, seq_len=S,
                             has_mask=use_mask, has_rw=use_rw)
    out = pl.pallas_call(
        kern,
        out_shape=out_struct,
        grid=(B // bt,),
        in_specs=in_specs,
        out_specs=out_spec,
        compiler_params=pltpu.CompilerParams(
            dimension_semantics=("parallel",),
            vmem_limit_bytes=vmem_limit),
    )(*inputs)
    return out.reshape(B, S, D)


def saa_reference(x, params, mask=False, attention_reweight=None):
    """Plain-JAX f32 transliteration of the torch forward, for validation."""
    B, S, D = x.shape
    H = params["num_heads"]
    dk = D // H
    lin = lambda t, w, b: t @ w.T + b
    q = lin(x, params["wq"], params["bq"]).reshape(B, S, H, dk).transpose(0, 2, 1, 3)
    k = lin(x, params["wk"], params["bk"]).reshape(B, S, H, dk).transpose(0, 2, 1, 3)
    v = lin(x, params["wv"], params["bv"]).reshape(B, S, H, dk).transpose(0, 2, 1, 3)
    scores = jnp.einsum("bhqd,bhkd->bhqk", q, k)
    if mask:
        tri = jnp.triu(jnp.ones((S, S), dtype=x.dtype), k=1)
        scores = scores - tri * 1e9
    scores = scores / jnp.sqrt(jnp.float32(dk))
    if attention_reweight is not None:
        scores = scores * attention_reweight[:, None, None, :]
    attn = jax.nn.softmax(scores, axis=-1)
    out = jnp.einsum("bhqk,bhkd->bhqd", attn, v)
    out = out.transpose(0, 2, 1, 3).reshape(B, S, D)
    return lin(out, params["wo"], params["bo"])


def make_params(key, d_model, num_heads):
    ks = jax.random.split(key, 8)
    s = 1.0 / jnp.sqrt(jnp.float32(d_model))
    p = {"num_heads": num_heads}
    for name, kw, kb in (("q", ks[0], ks[1]), ("k", ks[2], ks[3]),
                         ("v", ks[4], ks[5]), ("o", ks[6], ks[7])):
        p["w" + name] = jax.random.uniform(kw, (d_model, d_model),
                                           jnp.float32, -s, s)
        p["b" + name] = jax.random.uniform(kb, (d_model,), jnp.float32, -s, s)
    return p


if __name__ == "__main__":
    B, S, D, H = 2, 8, 32, 4
    key = jax.random.PRNGKey(0)
    kx, kp, kr = jax.random.split(key, 3)
    x = jax.random.normal(kx, (B, S, D), jnp.float32)
    params = make_params(kp, D, H)
    rw = jax.random.uniform(kr, (B, S), jnp.float32, 0.5, 1.5)

    # Tolerance reflects bf16 matmul operands (f32 accumulate) vs the f32 reference.
    TOL = dict(rtol=5e-2, atol=5e-2)

    # default (no mask, no reweight)
    out0 = jax.block_until_ready(saa_forward(x, params))
    ref0 = saa_reference(x, params)
    assert jnp.allclose(out0, ref0, **TOL), "mismatch (default)"

    # causal mask only (pre-scaled mask-bias path)
    out1 = jax.block_until_ready(saa_forward(x, params, mask=True))
    ref1 = saa_reference(x, params, mask=True)
    assert jnp.allclose(out1, ref1, **TOL), "mismatch (mask)"

    # reweight only
    out2 = jax.block_until_ready(saa_forward(x, params, attention_reweight=rw))
    ref2 = saa_reference(x, params, attention_reweight=rw)
    assert jnp.allclose(out2, ref2, **TOL), "mismatch (reweight)"

    # causal mask + reweight
    out3 = jax.block_until_ready(saa_forward(x, params, mask=True, attention_reweight=rw))
    ref3 = saa_reference(x, params, mask=True, attention_reweight=rw)
    assert jnp.allclose(out3, ref3, **TOL), "mismatch (mask+reweight)"

    print("KERNEL_OK")
</pallas_src>

<mosaic_0001>
module attributes {stable_mosaic.version = 11 : i64} {
  func.func @saa_kernel(%arg0: i32, %arg1: memref<1x8x32xbf16, #tpu.memory_space<vmem>>, %arg2: memref<32x96xbf16, #tpu.memory_space<vmem>>, %arg3: memref<1x96xf32, #tpu.memory_space<vmem>>, %arg4: memref<32x32xbf16, #tpu.memory_space<vmem>>, %arg5: memref<1x32xf32, #tpu.memory_space<vmem>>, %arg6: memref<1x8x32xf32, #tpu.memory_space<vmem>>) attributes {dimension_semantics = [#tpu.dimension_semantics<parallel>], iteration_bounds = array<i64: 2>, scalar_prefetch = 0 : i64, scratch_operands = 0 : i64, tpu.core_type = #tpu.core_type<tc>, window_params = [{transform_indices = @transform_0, window_bounds = array<i64: 1, 8, 32>}, {pipeline_mode = #tpu.pipeline_mode<synchronous>, transform_indices = @transform_1, window_bounds = array<i64: 32, 96>}, {pipeline_mode = #tpu.pipeline_mode<synchronous>, transform_indices = @transform_2, window_bounds = array<i64: 1, 96>}, {pipeline_mode = #tpu.pipeline_mode<synchronous>, transform_indices = @transform_3, window_bounds = array<i64: 32, 32>}, {pipeline_mode = #tpu.pipeline_mode<synchronous>, transform_indices = @transform_4, window_bounds = array<i64: 1, 32>}, {transform_indices = @transform_5, window_bounds = array<i64: 1, 8, 32>}]} {
    %c0 = arith.constant 0 : index
    %c0_0 = arith.constant 0 : index
    %c0_1 = arith.constant 0 : index
    %0 = vector.load %arg1[%c0, %c0_0, %c0_1] : memref<1x8x32xbf16, #tpu.memory_space<vmem>>, vector<1x8x32xbf16>
    %1 = vector.shape_cast %0 : vector<1x8x32xbf16> to vector<8x32xbf16>
    %c0_2 = arith.constant 0 : index
    %c0_3 = arith.constant 0 : index
    %2 = vector.load %arg2[%c0_2, %c0_3] : memref<32x96xbf16, #tpu.memory_space<vmem>>, vector<32x96xbf16>
    %cst = arith.constant dense<0.000000e+00> : vector<8x96xf32>
    %3 = tpu.matmul %1, %2, %cst {dimension_numbers = #tpu.dot_dimension_numbers<[1], [0], [0], [1], [0, 0, 1, 1], [], []>} : vector<8x32xbf16>, vector<32x96xbf16>, vector<8x96xf32> -> vector<8x96xf32>
    %c0_4 = arith.constant 0 : index
    %c0_5 = arith.constant 0 : index
    %4 = vector.load %arg3[%c0_4, %c0_5] : memref<1x96xf32, #tpu.memory_space<vmem>>, vector<1x96xf32>
    %5 = vector.broadcast %4 : vector<1x96xf32> to vector<8x96xf32>
    %6 = arith.addf %3, %5 : vector<8x96xf32>
    %7 = vector.extract_strided_slice %6 {offsets = [0, 0], sizes = [8, 32], strides = [1, 1]} : vector<8x96xf32> to vector<8x32xf32>
    %8 = vector.shape_cast %7 : vector<8x32xf32> to vector<1x8x32xf32>
    %9 = arith.truncf %8 : vector<1x8x32xf32> to vector<1x8x32xbf16>
    %10 = vector.extract_strided_slice %6 {offsets = [0, 32], sizes = [8, 32], strides = [1, 1]} : vector<8x96xf32> to vector<8x32xf32>
    %11 = vector.shape_cast %10 : vector<8x32xf32> to vector<1x8x32xf32>
    %12 = arith.truncf %11 : vector<1x8x32xf32> to vector<1x8x32xbf16>
    %13 = vector.extract_strided_slice %6 {offsets = [0, 64], sizes = [8, 32], strides = [1, 1]} : vector<8x96xf32> to vector<8x32xf32>
    %14 = vector.shape_cast %13 : vector<8x32xf32> to vector<1x8x32xf32>
    %15 = arith.truncf %14 : vector<1x8x32xf32> to vector<1x8x32xbf16>
    %16 = vector.extract_strided_slice %9 {offsets = [0, 0, 0], sizes = [1, 8, 8], strides = [1, 1, 1]} : vector<1x8x32xbf16> to vector<1x8x8xbf16>
    %17 = vector.extract_strided_slice %9 {offsets = [0, 0, 8], sizes = [1, 8, 8], strides = [1, 1, 1]} : vector<1x8x32xbf16> to vector<1x8x8xbf16>
    %18 = vector.extract_strided_slice %9 {offsets = [0, 0, 16], sizes = [1, 8, 8], strides = [1, 1, 1]} : vector<1x8x32xbf16> to vector<1x8x8xbf16>
    %19 = vector.extract_strided_slice %9 {offsets = [0, 0, 24], sizes = [1, 8, 8], strides = [1, 1, 1]} : vector<1x8x32xbf16> to vector<1x8x8xbf16>
    %20 = tpu.concatenate %16, %17, %18, %19 in 0 : vector<1x8x8xbf16>, vector<1x8x8xbf16>, vector<1x8x8xbf16>, vector<1x8x8xbf16> -> vector<4x8x8xbf16>
    %21 = vector.extract_strided_slice %12 {offsets = [0, 0, 0], sizes = [1, 8, 8], strides = [1, 1, 1]} : vector<1x8x32xbf16> to vector<1x8x8xbf16>
    %22 = vector.extract_strided_slice %12 {offsets = [0, 0, 8], sizes = [1, 8, 8], strides = [1, 1, 1]} : vector<1x8x32xbf16> to vector<1x8x8xbf16>
    %23 = vector.extract_strided_slice %12 {offsets = [0, 0, 16], sizes = [1, 8, 8], strides = [1, 1, 1]} : vector<1x8x32xbf16> to vector<1x8x8xbf16>
    %24 = vector.extract_strided_slice %12 {offsets = [0, 0, 24], sizes = [1, 8, 8], strides = [1, 1, 1]} : vector<1x8x32xbf16> to vector<1x8x8xbf16>
    %25 = tpu.concatenate %21, %22, %23, %24 in 0 : vector<1x8x8xbf16>, vector<1x8x8xbf16>, vector<1x8x8xbf16>, vector<1x8x8xbf16> -> vector<4x8x8xbf16>
    %26 = vector.extract_strided_slice %15 {offsets = [0, 0, 0], sizes = [1, 8, 8], strides = [1, 1, 1]} : vector<1x8x32xbf16> to vector<1x8x8xbf16>
    %27 = vector.extract_strided_slice %15 {offsets = [0, 0, 8], sizes = [1, 8, 8], strides = [1, 1, 1]} : vector<1x8x32xbf16> to vector<1x8x8xbf16>
    %28 = vector.extract_strided_slice %15 {offsets = [0, 0, 16], sizes = [1, 8, 8], strides = [1, 1, 1]} : vector<1x8x32xbf16> to vector<1x8x8xbf16>
    %29 = vector.extract_strided_slice %15 {offsets = [0, 0, 24], sizes = [1, 8, 8], strides = [1, 1, 1]} : vector<1x8x32xbf16> to vector<1x8x8xbf16>
    %30 = tpu.concatenate %26, %27, %28, %29 in 0 : vector<1x8x8xbf16>, vector<1x8x8xbf16>, vector<1x8x8xbf16>, vector<1x8x8xbf16> -> vector<4x8x8xbf16>
    "tpu.trace_start"() <{level = 10 : i32, message = "nqd,nkd->nqk"}> : () -> ()
    %cst_6 = arith.constant dense<0.000000e+00> : vector<4x8x8xf32>
    %31 = tpu.matmul %20, %25, %cst_6 {dimension_numbers = #tpu.dot_dimension_numbers<[2], [2], [1], [1], [0, 0, 0, 1, 1, 1], [0], [0]>} : vector<4x8x8xbf16>, vector<4x8x8xbf16>, vector<4x8x8xf32> -> vector<4x8x8xf32>
    "tpu.trace_stop"() : () -> ()
    %cst_7 = arith.constant 0.353553385 : f32
    %32 = vector.broadcast %cst_7 : f32 to vector<4x8x8xf32>
    %33 = arith.mulf %31, %32 : vector<4x8x8xf32>
    %cst_8 = arith.constant dense<0xFF800000> : vector<4x8xf32>
    %34 = vector.multi_reduction <maximumf>, %33, %cst_8 [2] : vector<4x8x8xf32> to vector<4x8xf32>
    %35 = vector.shape_cast %34 : vector<4x8xf32> to vector<4x8x1xf32>
    %36 = vector.broadcast %35 : vector<4x8x1xf32> to vector<4x8x8xf32>
    %37 = arith.subf %33, %36 : vector<4x8x8xf32>
    %38 = math.exp %37 : vector<4x8x8xf32>
    %cst_9 = arith.constant dense<0.000000e+00> : vector<4x8xf32>
    %39 = vector.multi_reduction <add>, %38, %cst_9 [2] : vector<4x8x8xf32> to vector<4x8xf32>
    %40 = vector.shape_cast %39 : vector<4x8xf32> to vector<4x8x1xf32>
    %41 = tpu.reciprocal %40 {approx = true} : vector<4x8x1xf32> -> vector<4x8x1xf32>
    %42 = vector.broadcast %41 : vector<4x8x1xf32> to vector<4x8x8xf32>
    %43 = arith.mulf %38, %42 : vector<4x8x8xf32>
    %44 = arith.truncf %43 : vector<4x8x8xf32> to vector<4x8x8xbf16>
    "tpu.trace_start"() <{level = 10 : i32, message = "nqk,nkd->nqd"}> : () -> ()
    %cst_10 = arith.constant dense<0.000000e+00> : vector<4x8x8xf32>
    %45 = tpu.matmul %44, %30, %cst_10 {dimension_numbers = #tpu.dot_dimension_numbers<[2], [1], [1], [2], [0, 0, 0, 1, 1, 2], [0], [0]>} : vector<4x8x8xbf16>, vector<4x8x8xbf16>, vector<4x8x8xf32> -> vector<4x8x8xf32>
    "tpu.trace_stop"() : () -> ()
    %46 = vector.extract_strided_slice %45 {offsets = [0, 0, 0], sizes = [1, 8, 8], strides = [1, 1, 1]} : vector<4x8x8xf32> to vector<1x8x8xf32>
    %47 = vector.extract_strided_slice %45 {offsets = [1, 0, 0], sizes = [1, 8, 8], strides = [1, 1, 1]} : vector<4x8x8xf32> to vector<1x8x8xf32>
    %48 = vector.extract_strided_slice %45 {offsets = [2, 0, 0], sizes = [1, 8, 8], strides = [1, 1, 1]} : vector<4x8x8xf32> to vector<1x8x8xf32>
    %49 = vector.extract_strided_slice %45 {offsets = [3, 0, 0], sizes = [1, 8, 8], strides = [1, 1, 1]} : vector<4x8x8xf32> to vector<1x8x8xf32>
    %50 = tpu.concatenate %46, %47, %48, %49 in 2 : vector<1x8x8xf32>, vector<1x8x8xf32>, vector<1x8x8xf32>, vector<1x8x8xf32> -> vector<1x8x32xf32>
    %51 = vector.shape_cast %50 : vector<1x8x32xf32> to vector<8x32xf32>
    %52 = arith.truncf %51 : vector<8x32xf32> to vector<8x32xbf16>
    %c0_11 = arith.constant 0 : index
    %c0_12 = arith.constant 0 : index
    %53 = vector.load %arg4[%c0_11, %c0_12] : memref<32x32xbf16, #tpu.memory_space<vmem>>, vector<32x32xbf16>
    %cst_13 = arith.constant dense<0.000000e+00> : vector<8x32xf32>
    %54 = tpu.matmul %52, %53, %cst_13 {dimension_numbers = #tpu.dot_dimension_numbers<[1], [0], [0], [1], [0, 0, 1, 1], [], []>} : vector<8x32xbf16>, vector<32x32xbf16>, vector<8x32xf32> -> vector<8x32xf32>
    %c0_14 = arith.constant 0 : index
    %c0_15 = arith.constant 0 : index
    %55 = vector.load %arg5[%c0_14, %c0_15] : memref<1x32xf32, #tpu.memory_space<vmem>>, vector<1x32xf32>
    %56 = vector.broadcast %55 : vector<1x32xf32> to vector<8x32xf32>
    %57 = arith.addf %54, %56 : vector<8x32xf32>
    %58 = vector.shape_cast %57 : vector<8x32xf32> to vector<1x8x32xf32>
    %c0_16 = arith.constant 0 : index
    %c0_17 = arith.constant 0 : index
    %c0_18 = arith.constant 0 : index
    %59 = vector.load %arg6[%c0_16, %c0_17, %c0_18] : memref<1x8x32xf32, #tpu.memory_space<vmem>>, vector<1x8x32xf32>
    tpu.vector_store %arg6[%c0_16, %c0_17, %c0_18], %58 {strides = array<i32>} : memref<1x8x32xf32, #tpu.memory_space<vmem>>, vector<1x8x32xf32>,
    return
  }
  func.func @transform_0(%arg0: i32) -> (i32, i32, i32) {
    %c0_i32 = arith.constant 0 : i32
    %c0_i32_0 = arith.constant 0 : i32
    %c0_i32_1 = arith.constant 0 : i32
    return %arg0, %c0_i32, %c0_i32_0 : i32, i32, i32
  }
  func.func @transform_1(%arg0: i32) -> (i32, i32) {
    %c0_i32 = arith.constant 0 : i32
    %c0_i32_0 = arith.constant 0 : i32
    %c0_i32_1 = arith.constant 0 : i32
    return %c0_i32, %c0_i32_0 : i32, i32
  }
  func.func @transform_2(%arg0: i32) -> (i32, i32) {
    %c0_i32 = arith.constant 0 : i32
    %c0_i32_0 = arith.constant 0 : i32
    %c0_i32_1 = arith.constant 0 : i32
    return %c0_i32, %c0_i32_0 : i32, i32
  }
  func.func @transform_3(%arg0: i32) -> (i32, i32) {
    %c0_i32 = arith.constant 0 : i32
    %c0_i32_0 = arith.constant 0 : i32
    %c0_i32_1 = arith.constant 0 : i32
    return %c0_i32, %c0_i32_0 : i32, i32
  }
  func.func @transform_4(%arg0: i32) -> (i32, i32) {
    %c0_i32 = arith.constant 0 : i32
    %c0_i32_0 = arith.constant 0 : i32
    %c0_i32_1 = arith.constant 0 : i32
    return %c0_i32, %c0_i32_0 : i32, i32
  }
  func.func @transform_5(%arg0: i32) -> (i32, i32, i32) {
    %c0_i32 = arith.constant 0 : i32
    %c0_i32_0 = arith.constant 0 : i32
    %c0_i32_1 = arith.constant 0 : i32
    return %arg0, %c0_i32, %c0_i32_0 : i32, i32, i32
  }
}

</mosaic_0001>

<bundles_post_ra>
// kernel: tpu_custom_call.1
= control target key start
LH: loop header
LB: loop body
LE: loop exit
PB: predicated region body
PF: predicated region fallthrough
CT: control target
= control target key end

     0   :  { %10 = vsyncpa [#allocation3], 0  ;;  %s1651_s0 = inlined_call_operand.hbm [shape: bf16[2,8,32], index: 0, kind: input, shape index: {}]   ;;  %s1652_s1 = inlined_call_operand.hbm [shape: bf16[32,96], index: 1, kind: input, shape index: {}]   ;;  %s1653_s2 = inlined_call_operand.vmem [shape: f32[1,96], index: 2, kind: input, shape index: {}]   ;;  %s1654_s3 = inlined_call_operand.hbm [shape: bf16[32,32], index: 3, kind: input, shape index: {}]   ;;  %s1655_s4 = inlined_call_operand.vmem [shape: f32[1,32], index: 4, kind: input, shape index: {}]   ;;  %s1656_s5 = inlined_call_operand.hbm [shape: f32[2,8,32], index: 5, kind: output, shape index: {}]  }
   0x1   :  { %12 = vsyncpa [#allocation3 + $0x1], 0 }
   0x2   :  { %13 = vsyncpa [#allocation6], 0 }
   0x3   :  { %14 = vsyncpa [#allocation4], 0 }
   0x4   :  { %16 = vsyncpa [#allocation4 + $0x1], 0  ;;  %s1385_s18 = smov 0   ;;  %s1387_s19 = smov 0  }
   0x5   :  { %s1389_s20 = smov 0   ;;  %s1391_s21 = smov 0  }
   0x6 LB: > { %s1406_s22 = sadd.s32 4294967295, %s1337_s21   ;;  %s972_s23 = sadd.s32 4294967294, %s1337_s21   ;;  %s1337_s21 = sphi %s1391_s21, %s1678_s21   ;;  %s1333_s20 = sphi %s1389_s20, %s1677_s20   ;;  %s1329_s19 = sphi %s1387_s19, %s1676_s19   ;;  %s1325_s18 = sphi %s1385_s18, %s1675_s18  }
   0x7   : > { %p42_p0 = scmp.ne.s32.totalorder %s1329_s19, %s1325_s18  ;;  %p1657_p1 = scmp.eq.s32.totalorder %s1406_s22, 0 }
   0x8   : > { %p156_p3 = scmp.eq.s32.totalorder %s972_s23, 1  ;;  %p973_p5 = scmp.ge.s32.totalorder %s1337_s21, 1 }
   0x9   : > { %p1415_p4 = por %p1657_p1, %p42_p0  ;;  %p163_p7 = scmp.lt.s32.totalorder %s1337_s21, 3 }
   0xa   : > { %p1420_p6 = por %p156_p3, %p42_p0  ;;  %s1339_s27 = smov [#allocation5]  }
   0xb   : > { %s1661_s24 = scalar_select %p1415_p4, 1, 0 }
   0xc   : > { %s1662_s25 = scalar_select %p1420_p6, 1, 0 }
   0xd   : > { %p1425_p8 = pnand %p973_p5, %p163_p7  ;;  %s175_s28 = sshll.u32 %s1339_s27, 4  ;;  %s176_s28 = int_to_ptr.vmem [resolvable:$true] %s175_s28 }
   0xe   : > { %s1340_s30 = smov [#allocation7]   ;;  %s1200_s7 = scalar_lea.vmem %s176_s28, 256 }
   0xf   : > { %s1663_s26 = scalar_select %p1425_p8, 1, 0 }
  0x10   : > { %p1102_p9 = pneg %p1425_p8  ;;  %s191_s6 = sshll.u32 %s1340_s30, 4  ;;  %s192_s6 = int_to_ptr.vmem [resolvable:$true] %s191_s6 }
  0x11   : > { %p1201_p13 = scmp.ne.s32.totalorder %s176_s28, %s1200_s7  ;;  %p1208_p5 = scmp.lt.s32.totalorder %s176_s28, %s176_s28 }
  0x12   : > { %p1434_p11 = pnand %p1102_p9, %p1657_p1  ;;  %p1209_p7 = scmp.lt.s32.totalorder %s1200_s7, %s1200_s7 }
  0x14   : > { %p1191_p12 = pneg %p1434_p11  ;;  %p1210_p10 = por %p1209_p7, %p1208_p5 }
  0x16   : > { %p1203_p0 = pnand %p1201_p13, %p1191_p12 }
  0x18   : > { %p1204_p3 = pneg %p1203_p0 }
  0x1a   : > { %p1211_p9 = pnand %p1210_p10, %p1204_p3 }
  0x1c   : > { %1214 = shalt.err (!%p1211_p9)
}
  0x1d   : > { %s1341_s8 = smov 64   ;;  %s1342_s9 = smov 4  }
  0x1e   : > { %1105 = dma.hbm_to_vmem [thread:$0]  (!%p1434_p11), %s1652_s1, 256, %s176_s28, [#allocation6], %s1341_s8, %s1341_s8, %s1342_s9  }
  0x1f   : > { %s1226_s12 = scalar_lea.vmem %s192_s6, 256  ;;  %p1234_p2 = scmp.lt.s32.totalorder %s192_s6, %s192_s6 }
  0x20   : > { %p1227_p1 = scmp.ne.s32.totalorder %s192_s6, %s1226_s12  ;;  %p1235_p6 = scmp.lt.s32.totalorder %s1226_s12, %s1226_s12 }
  0x22   : > { %p1229_p13 = pnand %p1227_p1, %p1191_p12  ;;  %p1236_p5 = por %p1235_p6, %p1234_p2 }
  0x24   : > { %p1230_p0 = pneg %p1229_p13 }
  0x26   : > { %p1237_p10 = pnand %p1236_p5, %p1230_p0 }
  0x28   : > { %1240 = shalt.err (!%p1237_p10)
}
  0x29   : > { %1108 = dma.hbm_to_vmem [thread:$0]  (!%p1434_p11), %s1654_s3, 256, %s192_s6, [#allocation6], %s1341_s8, %s1341_s8, %s1342_s9  }
  0x2a   : > { %s1457_s15 = sadd.s32 1, %s1337_s21   ;;  %s29_s16 = sadd.s32 1, %s1333_s20 }
  0x2b   : > { %s26_s17 = ssub.s32 %s1337_s21, %s1457_s15  ;;  %p36_p1 = scmp.ne.s32.totalorder %s1333_s20, %s1329_s19 }
  0x2c   : > { %p27_p2 = scmp.eq.s32.totalorder %s26_s17, 0  ;;  %p37_p6 = scmp.eq.s32.totalorder %s1337_s21, 0 }
  0x2d   : > { %p1665_p12 = scmp.eq.s32.totalorder %s1406_s22, 1  ;;  %p1119_p7 = scmp.lt.s32.totalorder %s1337_s21, 2 }
  0x2e   : > { %s1473_s27 = scalar_select %p27_p2, %s1333_s20, %s29_s16  }
  0x2f   : > { %p1467_p3 = por %p1665_p12, %p36_p1  ;;  %p38_p9 = por %p37_p6, %p36_p1 }
  0x30   : > { %s208_s28 = sand.u32 1, %s1333_s20   ;;  %s978_s30 = sshll.u32 %s1337_s21, 6 }
  0x31   : > { %s1666_s23 = scalar_select %p1467_p3, 1, 0 }
  0x32   : > { %s977_s29 = sshll.u32 %s208_s28, 2  ;;  %s1480_s8 = scalar_lea.hbm %s1651_s0, %s978_s30 }
  0x33   : > { %s212_s9 = scalar_lea.vmem [#allocation2], %s977_s29  ;;  %p1482_p11 = pnand %p1119_p7, %p38_p9 }
  0x34   : > { %s219_s10 = sshll.u32 %s212_s9, 4  ;;  %s209_s12 = scalar_lea.sflag [#allocation3], %s208_s28  ;;  %s220_s10 = int_to_ptr.vmem [resolvable:$true] %s219_s10 }
  0x35   : > { %s1241_s13 = scalar_lea.hbm %s1480_s8, 64  ;;  %p1243_p0 = pneg %p1482_p11 }
  0x36   : > { %p1242_p13 = scmp.ne.s32.totalorder %s1480_s8, %s1241_s13  ;;  %s1246_s17 = scalar_lea.hbm %s1651_s0, 128 }
  0x37   : > { %p1247_p1 = scmp.lt.s32.totalorder %s1480_s8, %s1651_s0  ;;  %p1248_p2 = scmp.lt.s32.totalorder %s1246_s17, %s1241_s13 }
  0x38   : > { %p1244_p5 = pnand %p1243_p0, %p1242_p13 }
  0x39   : > { %p1249_p6 = por %p1248_p2, %p1247_p1 }
  0x3a   : > { %p1245_p10 = pneg %p1244_p5 }
  0x3c   : > { %p1250_p12 = pnand %p1249_p6, %p1245_p10 }
  0x3e   : > { %1253 = shalt.err (!%p1250_p12)
}
  0x3f   : > { %s1254_s6 = scalar_lea.vmem %s220_s10, 64  ;;  %s1343_s28 = smov [#allocation2]  }
  0x40   : > { %p1255_p7 = scmp.ne.s32.totalorder %s220_s10, %s1254_s6  ;;  %s1259_s7 = sshll.u32 %s1343_s28, 4  ;;  %s1260_s7 = int_to_ptr.vmem [resolvable:$false] %s1259_s7 }
  0x41   : > { %s1261_s9 = scalar_lea.vmem %s1260_s7, 128  ;;  %p1262_p13 = scmp.lt.s32.totalorder %s220_s10, %s1260_s7 }
  0x42   : > { %p1257_p9 = pnand %p1255_p7, %p1243_p0  ;;  %p1263_p5 = scmp.lt.s32.totalorder %s1261_s9, %s1254_s6 }
  0x44   : > { %p1258_p3 = pneg %p1257_p9  ;;  %p1264_p4 = por %p1263_p5, %p1262_p13 }
  0x46   : > { %p1265_p8 = pnand %p1264_p4, %p1258_p3 }
  0x48   : > { %1268 = shalt.err (!%p1265_p8)
}
  0x49   : > { %1112 = dma.hbm_to_vmem [thread:$0]  (!%p1482_p11), %s1480_s8, 64, %s220_s10, %s209_s12  }
  0x4a   : > { %p1668_p10 = scmp.ne.s32.totalorder %s1663_s26, 0 }
  0x4b   : > { %s1503_s13 = sand.u32 (!%p1668_p10), 1, %s1329_s19   ;;  %p1669_p0 = scmp.ne.s32.totalorder (!%p1668_p10), %s1661_s24, 0 }
  0x4c   : > { %228 = sbr.rel (%p1668_p10) target bundleno = 1567 (0x61f), region = 40  ;;  %s980_s14 = sshll.u32 (!%p1668_p10), %s1503_s13, 2 }
  0x4d   : > { %s231_s16 = scalar_lea.sflag (!%p1668_p10), [#allocation3], %s1503_s13  ;;  %s234_s17 = scalar_lea.vmem (!%p1668_p10), [#allocation2], %s980_s14 }
  0x51   : > { %1312 = dma.done.wait (%p1669_p0), %s231_s16, 64  }
  0x52   : > { %1314 = vsyncadd (%p1669_p0), %s231_s16, 4294967232  ;;  %p1670_p4 = scmp.eq.s32.totalorder %s1406_s22, 0 }
  0x54   : > { %1316 = dma.done.wait (%p1670_p4), [#allocation6], 512   ;;  %p1671_p8 = pmov %p1670_p4 }
  0x55   : > { %v1344_v0 = vmov 0.0   ;;  %vm1345_vm0 = vmmov 0   ;;  %v1169_v1 = vld [vmem:[#allocation5 + $0x8] sm:$0xff]   ;;  %v1170_v2 = vld [vmem:[#allocation5] sm:$0xff]   ;;  %v270_v3 = vld [vmem:[%s234_s17] sm:$0xf] }
  0x56   : > { %1318 = vsyncadd (%p1671_p8), [#allocation6], 4294966784  ;;  %1026 = vmatprep.subr.bf16.mxu0 %v1344_v0  ;;  %1030 = vmatprep.mubr.msk.bf16.mxu0 %vm1345_vm0, %v1344_v0  ;;  %vm294_vm1 = vcmask 261120   ;;  %v984_v4 = vld [vmem:[%s1653_s2] ss:$0 sm:$0xff]  ;;  %s1346_s8 = smov 104  }
  0x57   : > { %1034 = vmatprep.subr.bf16.mxu1 %v1344_v0  ;;  %1036 = vmatprep.mubr.msk.bf16.mxu1 %vm1345_vm0, %v1344_v0  ;;  %s1347_s10 = smov 120   ;;  %s1348_s11 = smov 96   ;;  %vm348_vm2 = vcmask 64512   ;;  %vm596_vm3 = vcmask 1043456   ;;  %vm797_vm4 = vcmask 130048   ;;  %vm799_vm5 = vcmask 195584  }
  0x58   : > { %1027 = vmatpush3.bf16.msra.mxu0 %v1169_v1  ;;  %s1349_s12 = smov 112   ;;  %s1350_s30 = smov 64  }
  0x59   : > { %1028 = vmatprep.subr.bf16.mxu0 %v1344_v0  ;;  %s1351_s29 = smov 8   ;;  %s1352_s6 = smov 16  }
  0x5a   : > { %s1353_s28 = smov 24   ;;  %s983_s7 = sshll.u32 %s1503_s13, 3 }
  0x5b   : > { %s1001_s16 = sshll.u32 %s1406_s22, 7  ;;  %s268_s17 = scalar_lea.vmem [#allocation8], %s983_s7 }
  0x5c   : > { %1029 = vmatpush3.bf16.msra.mxu0 %v1170_v2  ;;  %s883_s24 = sshll.u32 %s268_s17, 4  ;;  %p1672_p11 = scmp.ne.s32.totalorder %s1666_s23, 0  ;;  %s1609_s24 = int_to_ptr.vmem [resolvable:$true] %s883_s24 }
  0x5d   : > { %1040 = vmatprep.subr.bf16.mxu0 %v1344_v0  ;;  %s1269_s22 = scalar_lea.vmem %s1609_s24, 128 }
  0x5e   : > { %p1270_p3 = scmp.ne.s32.totalorder %s1609_s24, %s1269_s22 }
  0x5f   : > { %1031 = vmatmul.mubr.msk.bf16.vlgmr.msra.gmra.mxu0 %vm294_vm1, %v270_v3 }
  0x60   : > { %1042 = vmatprep.mubr.msk.bf16.mxu0 %vm1345_vm0, %v1344_v0  ;;  %p1271_p1 = pnand %p1270_p3, %p1672_p11 }
  0x62   : > { %p1272_p2 = pneg %p1271_p1 }
 0x11f   : > { %v332_v5 = vpop.f32.mrf.mxu0 }
 0x120   : > { %v333_v6 = vadd.f32 %v984_v4, %v332_v5 }
 0x121   : > { %v1032_v7 = vpop.f32.mrf.mxu0 }
 0x122   : > { %v1529_v8 = vpack.c.bf16 %v333_v6, %v333_v6 }
 0x123   : > { %v335_v9 = vpop.f32.mrf.mxu0 }
 0x124   : > { %344 = vrot.lane.b32.xlu1 %v1529_v8, %s1346_s8  ;;  %340 = vrot.lane.b32.xlu0 %v1529_v8, %s1347_s10  ;;  %s1607_s10 = scalar_lea.hbm %s1656_s5, %s1001_s16 }
 0x125   : > { %v1033_v10 = vpop.f32.mrf.mxu0 }
 0x128   : > { %346 = vrot.lane.b32.xlu1 %v1529_v8, %s1348_s11  ;;  %342 = vrot.lane.b32.xlu0 %v1529_v8, %s1349_s12  ;;  %s1354_s12 = smov [#allocation8]  }
 0x196   : > { %v1535_v11 = vpop.permute.xlu1 %344  ;;  %v341_v12 = vpop.permute.xlu0 %340 }
 0x197   : > { %395 = vrot.lane.b32.xlu0 %v341_v12, %s1348_s11 }
 0x19a   : > { %v347_v13 = vpop.permute.xlu1 %346  ;;  %v1537_v14 = vpop.permute.xlu0 %342 }
 0x19b   : > { %491 = vrot.lane.b32.xlu0 %v1535_v11, %s1348_s11  ;;  %443 = vrot.lane.b32.xlu1 %v1537_v14, %s1348_s11  ;;  %v353_v15 = vsel %vm348_vm2, %v347_v13, 0  ;;  %s870_s11 = scalar_lea.sflag [#allocation4], %s1503_s13 }
 0x19c   : > { %1035 = vmatpush3.bf16.xpose.msra.mxu1 %v353_v15 }
 0x19d   : > { %1046 = vmatprep.subr.bf16.mxu1 %v1344_v0 }
 0x1a3   : > { %1037 = vmatmul.mubr.msk.bf16.vlgmr.msra.gmra.mxu1 %vm348_vm2, %v1529_v8 }
 0x1a4   : > { %1048 = vmatprep.mubr.msk.bf16.mxu1 %vm1345_vm0, %v1344_v0 }
 0x209   : > { %v396_v16 = vpop.permute.xlu0 %395 }
 0x20a   : > { %v401_v17 = vsel %vm348_vm2, %v396_v16, 0 }
 0x20b   : > { %1041 = vmatpush3.bf16.xpose.msra.mxu0 %v401_v17 }
 0x20c   : > { %1052 = vmatprep.subr.bf16.mxu0 %v1344_v0 }
 0x20d   : > { %v444_v18 = vpop.permute.xlu1 %443  ;;  %v492_v20 = vpop.permute.xlu0 %491 }
 0x20e   : > { %v449_v19 = vsel %vm348_vm2, %v444_v18, 0  ;;  %v497_v21 = vsel %vm348_vm2, %v492_v20, 0 }
 0x20f   : > { %1047 = vmatpush3.bf16.xpose.msra.mxu1 %v449_v19 }
 0x210   : > { %1058 = vmatprep.subr.bf16.mxu1 %v1344_v0 }
 0x212   : > { %1043 = vmatmul.mubr.msk.bf16.vlgmr.msra.gmra.mxu0 %vm348_vm2, %v341_v12 }
 0x213   : > { %1053 = vmatpush3.bf16.xpose.msra.mxu0 %v497_v21  ;;  %1054 = vmatprep.mubr.msk.bf16.mxu0 %vm1345_vm0, %v1344_v0 }
 0x214   : > { %1064 = vmatprep.subr.bf16.mxu0 %v1344_v0 }
 0x216   : > { %1049 = vmatmul.mubr.msk.bf16.vlgmr.msra.gmra.mxu1 %vm348_vm2, %v1537_v14 }
 0x217   : > { %1060 = vmatprep.mubr.msk.bf16.mxu1 %vm1345_vm0, %v1344_v0 }
 0x21a   : > { %1055 = vmatmul.mubr.msk.bf16.vlgmr.msra.gmra.mxu0 %vm348_vm2, %v1535_v11 }
 0x21b   : > { %1066 = vmatprep.mubr.msk.bf16.mxu0 %vm1345_vm0, %v1344_v0 }
 0x263   : > { %v389_v22 = vpop.f32.mrf.mxu1 }
 0x264   : > { %v539_v23 = vmul.f32 0.35355338, %v389_v22 }
 0x265   : > { %v1038_v24 = vpop.f32.mrf.mxu1 }
 0x266   : > { %v543_v25 = vsel %vm348_vm2, %v539_v23, -inf }
 0x267   : > { %v392_v26 = vpop.f32.mrf.mxu1  ;;  %544 = vmax.xlane.f32.xlu1 %v543_v25 }
 0x269   : > { %v1039_v27 = vpop.f32.mrf.mxu1 }
 0x2d2   : > { %v437_v28 = vpop.f32.mrf.mxu0 }
 0x2d3   : > { %v540_v29 = vmul.f32 0.35355338, %v437_v28 }
 0x2d4   : > { %v1044_v30 = vpop.f32.mrf.mxu0 }
 0x2d5   : > { %v546_v31 = vsel %vm348_vm2, %v540_v29, -inf }
 0x2d6   : > { %v485_v32 = vpop.f32.mrf.mxu1  ;;  %547 = vmax.xlane.f32.xlu0 %v546_v31  ;;  %v440_v33 = vpop.f32.mrf.mxu0  ;;  %v1171_v31 = vld [vmem:[#allocation7 + $0x8] sm:$0xff]  }
 0x2d7   : > { %v541_v34 = vmul.f32 0.35355338, %v485_v32  ;;  %v1172_v32 = vld [vmem:[#allocation7] sm:$0xff]  }
 0x2d8   : > { %v1045_v35 = vpop.f32.mrf.mxu0  ;;  %v1050_v36 = vpop.f32.mrf.mxu1 }
 0x2d9   : > { %v549_v37 = vsel %vm348_vm2, %v541_v34, -inf }
 0x2da   : > { %v488_v38 = vpop.f32.mrf.mxu1  ;;  %550 = vmax.xlane.f32.xlu0 %v549_v37  ;;  %v533_v39 = vpop.f32.mrf.mxu0 }
 0x2db   : > { %v542_v40 = vmul.f32 0.35355338, %v533_v39 }
 0x2dc   : > { %v1051_v41 = vpop.f32.mrf.mxu1  ;;  %v1056_v42 = vpop.f32.mrf.mxu0 }
 0x2dd   : > { %v552_v43 = vsel %vm348_vm2, %v542_v40, -inf }
 0x2de   : > { %553 = vmax.xlane.f32.xlu1 %v552_v43  ;;  %v536_v44 = vpop.f32.mrf.mxu0 }
 0x2e0   : > { %v1057_v45 = vpop.f32.mrf.mxu0 }
 0x2ef   : > { %640 = vrot.lane.b32.xlu1 %v341_v12, %s1350_s30 }
 0x2f0   : > { %591 = vrot.lane.b32.xlu0 %v1529_v8, %s1350_s30  ;;  %v545_v46 = vpop.xlane.xlu1 %544 }
 0x2f1   : > { %v555_v47 = vsub.f32 %v539_v23, %v545_v46 }
 0x2f3   : > { %v559_v48 = vmul.f32 1.442695, %v555_v47 }
 0x2f5   : > { %1173 = vpow2.f32 %v559_v48 }
 0x302   : > { %v1174_v49 = vpop.eup %1173 }
 0x303   : > { %v567_v50 = vsel %vm348_vm2, %v1174_v49, 0.0 }
 0x30f   : > { %568 = vadd.xlane.f32.xlu0 %v567_v50 }
 0x35f   : > { %v548_v51 = vpop.xlane.xlu0 %547 }
 0x360   : > { %v556_v52 = vsub.f32 %v540_v29, %v548_v51  ;;  %v996_v51 = vld [vmem:[%s1655_s4] ss:$0 sm:$0xff] }
 0x362   : > { %v561_v53 = vmul.f32 1.442695, %v556_v52 }
 0x363   : > { %v551_v54 = vpop.xlane.xlu0 %550 }
 0x364   : > { %1175 = vpow2.f32 %v561_v53  ;;  %v557_v55 = vsub.f32 %v541_v34, %v551_v54 }
 0x366   : > { %v563_v56 = vmul.f32 1.442695, %v557_v55 }
 0x367   : > { %v592_v57 = vpop.permute.xlu0 %591  ;;  %v554_v58 = vpop.xlane.xlu1 %553 }
 0x368   : > { %1177 = vpow2.f32 %v563_v56  ;;  %v598_v59 = vsel %vm596_vm3, %v592_v57, 0  ;;  %v558_v60 = vsub.f32 %v542_v40, %v554_v58 }
 0x369   : > { %1059 = vmatpush3.bf16.msra.mxu1 %v598_v59 }
 0x36a   : > { %v565_v61 = vmul.f32 1.442695, %v558_v60  ;;  %1070 = vmatprep.subr.bf16.mxu1 %v1344_v0 }
 0x36b   : > { %v641_v62 = vpop.permute.xlu1 %640 }
 0x36c   : > { %1179 = vpow2.f32 %v565_v61  ;;  %v646_v63 = vsel %vm596_vm3, %v641_v62, 0 }
 0x36d   : > { %1065 = vmatpush3.bf16.msra.mxu0 %v646_v63 }
 0x36e   : > { %1076 = vmatprep.subr.bf16.mxu0 %v1344_v0 }
 0x371   : > { %v1176_v1 = vpop.eup %1175 }
 0x372   : > { %v570_v2 = vsel %vm348_vm2, %v1176_v1, 0.0 }
 0x373   : > { %571 = vadd.xlane.f32.xlu1 %v570_v2 }
 0x375   : > { %v1178_v3 = vpop.eup %1177 }
 0x376   : > { %v573_v4 = vsel %vm348_vm2, %v1178_v3, 0.0 }
 0x377   : > { %574 = vadd.xlane.f32.xlu0 %v573_v4 }
 0x379   : > { %v1180_v5 = vpop.eup %1179 }
 0x37a   : > { %v576_v6 = vsel %vm348_vm2, %v1180_v5, 0.0 }
 0x37b   : > { %577 = vadd.xlane.f32.xlu1 %v576_v6 }
 0x38c   : > { %688 = vrot.lane.b32.xlu1 %v1537_v14, %s1350_s30 }
 0x38d   : > { %736 = vrot.lane.b32.xlu0 %v1535_v11, %s1350_s30  ;;  %s1273_s30 = sshll.u32 %s1354_s12, 4  ;;  %s1274_s30 = int_to_ptr.vmem [resolvable:$false] %s1273_s30 }
 0x38e   : > { %p1276_p6 = scmp.lt.s32.totalorder %s1609_s24, %s1274_s30 }
 0x398   : > { %v569_v7 = vpop.xlane.xlu0 %568 }
 0x399   : > { %1181 = vrcp.f32 %v569_v7 }
 0x3a6   : > { %v1182_v8 = vpop.eup %1181 }
 0x3a7   : > { %v583_v9 = vmul.f32 %v1182_v8, %v1174_v49 }
 0x3a9   : > { %v587_v10 = vpack.c.bf16 %v583_v9, %v583_v9 }
 0x3ab   : > { %1061 = vmatmul.mubr.msk.bf16.vlgmr.msra.gmra.mxu1 %vm348_vm2, %v587_v10 }
 0x3ac   : > { %1072 = vmatprep.mubr.msk.bf16.mxu1 %vm1345_vm0, %v1344_v0 }
 0x3fc   : > { %v572_v12 = vpop.xlane.xlu1 %571 }
 0x3fd   : > { %1183 = vrcp.f32 %v572_v12 }
 0x400   : > { %v575_v13 = vpop.xlane.xlu0 %574 }
 0x401   : > { %1185 = vrcp.f32 %v575_v13 }
 0x404   : > { %v578_v15 = vpop.xlane.xlu1 %577  ;;  %v737_v18 = vpop.permute.xlu0 %736 }
 0x405   : > { %1187 = vrcp.f32 %v578_v15  ;;  %v742_v21 = vsel %vm596_vm3, %v737_v18, 0 }
 0x408   : > { %v689_v14 = vpop.permute.xlu1 %688 }
 0x409   : > { %v694_v16 = vsel %vm596_vm3, %v689_v14, 0 }
 0x40a   : > { %v1184_v11 = vpop.eup %1183  ;;  %1071 = vmatpush3.bf16.msra.mxu1 %v694_v16 }
 0x40b   : > { %v584_v17 = vmul.f32 %v1184_v11, %v1176_v1  ;;  %1082 = vmatprep.subr.bf16.mxu1 %v1344_v0 }
 0x40d   : > { %v588_v19 = vpack.c.bf16 %v584_v17, %v584_v17 }
 0x40e   : > { %v1186_v20 = vpop.eup %1185 }
 0x40f   : > { %1067 = vmatmul.mubr.msk.bf16.vlgmr.msra.gmra.mxu0 %vm348_vm2, %v588_v19  ;;  %v585_v22 = vmul.f32 %v1186_v20, %v1178_v3 }
 0x410   : > { %1077 = vmatpush3.bf16.msra.mxu0 %v742_v21  ;;  %1078 = vmatprep.mubr.msk.bf16.mxu0 %vm1345_vm0, %v1344_v0 }
 0x411   : > { %v589_v23 = vpack.c.bf16 %v585_v22, %v585_v22 }
 0x412   : > { %v1188_v24 = vpop.eup %1187 }
 0x413   : > { %1073 = vmatmul.mubr.msk.bf16.vlgmr.msra.gmra.mxu1 %vm348_vm2, %v589_v23  ;;  %v586_v25 = vmul.f32 %v1188_v24, %v1180_v5 }
 0x414   : > { %1086 = vmatprep.mubr.msk.bf16.mxu1 %vm1345_vm0, %v1344_v0  ;;  %1083 = vmatpush3.bf16.msra.mxu1 %v1171_v31 }
 0x415   : > { %v590_v26 = vpack.c.bf16 %v586_v25, %v586_v25  ;;  %1084 = vmatprep.subr.bf16.mxu1 %v1344_v0 }
 0x417   : > { %1079 = vmatmul.mubr.msk.bf16.vlgmr.msra.gmra.mxu0 %vm348_vm2, %v590_v26 }
 0x418   : > { %1085 = vmatpush3.bf16.msra.mxu1 %v1172_v32 }
 0x46b   : > { %v634_v27 = vpop.f32.mrf.mxu1 }
 0x46d   : > { %v1062_v28 = vpop.f32.mrf.mxu1 }
 0x46f   : > { %v637_v29 = vpop.f32.mrf.mxu1 }
 0x471   : > { %v1063_v30 = vpop.f32.mrf.mxu1 }
 0x4cf   : > { %v682_v33 = vpop.f32.mrf.mxu0 }
 0x4d0   : > { %785 = vrot.lane.b32.xlu1 %v682_v33, %s1351_s29  ;;  %s1275_s29 = scalar_lea.vmem %s1274_s30, 256 }
 0x4d1   : > { %v1068_v34 = vpop.f32.mrf.mxu0  ;;  %p1277_p12 = scmp.lt.s32.totalorder %s1275_s29, %s1269_s22 }
 0x4d3   : > { %v685_v35 = vpop.f32.mrf.mxu0  ;;  %v730_v36 = vpop.f32.mrf.mxu1  ;;  %p1278_p7 = por %p1277_p12, %p1276_p6 }
 0x4d4   : > { %789 = vrot.lane.b32.xlu0 %v730_v36, %s1352_s6 }
 0x4d5   : > { %v1069_v37 = vpop.f32.mrf.mxu0  ;;  %v1074_v38 = vpop.f32.mrf.mxu1  ;;  %p1279_p9 = pnand %p1278_p7, %p1272_p2 }
 0x4d7   : > { %v733_v39 = vpop.f32.mrf.mxu1  ;;  %v778_v40 = vpop.f32.mrf.mxu0 }
 0x4d8   : > { %793 = vrot.lane.b32.xlu1 %v778_v40, %s1353_s28 }
 0x4d9   : > { %v1075_v41 = vpop.f32.mrf.mxu1  ;;  %v1080_v0 = vpop.f32.mrf.mxu0 }
 0x4db   : > { %v781_v42 = vpop.f32.mrf.mxu0 }
 0x4dd   : > { %v1081_v43 = vpop.f32.mrf.mxu0 }
 0x542   : > { %v786_v44 = vpop.permute.xlu1 %785 }
 0x543   : > { %v796_v46 = vsel %vm348_vm2, %v634_v27, %v786_v44 }
 0x546   : > { %v790_v45 = vpop.permute.xlu0 %789 }
 0x547   : > { %v798_v47 = vsel %vm797_vm4, %v796_v46, %v790_v45 }
 0x54a   : > { %v794_v48 = vpop.permute.xlu1 %793 }
 0x54b   : > { %v800_v49 = vsel %vm799_vm5, %v798_v47, %v794_v48 }
 0x54c   : > { %v801_v50 = vpack.c.bf16 %v800_v49, %v800_v49 }
 0x54e   : > { %1087 = vmatmul.mubr.msk.bf16.vlgmr.msra.gmra.mxu1 %vm294_vm1, %v801_v50 }
 0x60e   : > { %v862_v52 = vpop.f32.mrf.mxu1 }
 0x60f   : > { %v863_v53 = vadd.f32 %v996_v51, %v862_v52 }
 0x610   : > { %v1088_v54 = vpop.f32.mrf.mxu1 }
 0x611   : > { %868 = vst.msk [vmem:[%s268_s17] sm:$0xff] %vm294_vm1, %v863_v53 }
 0x612   : > { %v865_v55 = vpop.f32.mrf.mxu1 }
 0x613   : > { %1282 = shalt.err (!%p1279_p9)
}
 0x614   : > { %s1283_s6 = scalar_lea.hbm %s1607_s10, 128  ;;  %s1287_s7 = scalar_lea.hbm %s1656_s5, 256 }
 0x615   : > { %p1284_p13 = scmp.ne.s32.totalorder %s1607_s10, %s1283_s6  ;;  %p1288_p0 = scmp.lt.s32.totalorder %s1607_s10, %s1656_s5 }
 0x616   : > { %p1289_p4 = scmp.lt.s32.totalorder %s1287_s7, %s1283_s6 }
 0x617   : > { %p1285_p5 = pnand %p1284_p13, %p1672_p11 }
 0x618   : > { %p1290_p8 = por %p1289_p4, %p1288_p0 }
 0x619   : > { %p1286_p10 = pneg %p1285_p5 }
 0x61b   : > { %p1291_p3 = pnand %p1290_p8, %p1286_p10 }
 0x61d   : > { %1294 = shalt.err (!%p1291_p3)
}
 0x61e   : > { %1100 = dma.vmem_to_hbm [thread:$0]  (%p1672_p11), %s1609_s24, 128, %s1607_s10, %s870_s11   ;;  %v1089_v56 = vpop.f32.mrf.mxu1 }
 0x61f PF: > { %s895_s16 = sand.u32 1, %s1325_s18   ;;  %p1673_p1 = scmp.ne.s32.totalorder %s1662_s25, 0 }
 0x620   : > { %p1674_p2 = scmp.ge.s32.totalorder %s1337_s21, 2  ;;  %s896_s17 = scalar_lea.sflag [#allocation4], %s895_s16 }
 0x622   : > { %p1114_p6 = pnand %p1674_p2, %p1673_p1 }
 0x624   : > { %p1115_p12 = pneg %p1114_p6 }
 0x626   : > { %1320 = dma.done.wait (%p1115_p12), %s896_s17, 128  }
 0x627   : > { %1322 = vsyncadd (%p1115_p12), %s896_s17, 4294967168  ;;  %p19_p7 = scmp.ge.s32.totalorder %s1457_s15, 4   ;;  %s1675_s18 = smov %s1329_s19 }
 0x628   : > { %s1676_s19 = smov %s1333_s20  ;;  %s1677_s20 = smov %s1473_s27 }
 0x629   : > { %s1678_s21 = smov %s1457_s15  ;;  %21 = sbr.rel (!%p19_p7) target bundleno = 6 (0x6), region = 93 }
 0x62e   :  { %901 = vsyncpa [#allocation3], 1 }
 0x62f   :  { %903 = vsyncpa [#allocation3 + $0x1], 1 }
 0x630   :  { %904 = vsyncpa [#allocation6], 1 }
 0x631   :  { %905 = vsyncpa [#allocation4], 1 }
 0x632   :  { %907 = vsyncpa [#allocation4 + $0x1], 1 }

</bundles_post_ra>
